<compile_context>
chip_gen: v6e
topology: v6e:2x2x1
jax: 0.10.0
libtpu: 0.0.40
codegen_flags: <defaults>
</compile_context>

<pallas_src>
import functools
import math

import jax
import jax.numpy as jnp
from jax.experimental import pallas as pl
from jax.experimental.pallas import tpu as pltpu


def attention_kernel(x_ref, k_ref, v_ref, mask_ref, o_ref, *, mxu_dtype):
    # x/k/v/o blocks: (Bb, S, D); mask block: (Bb, S, S) or (1, S, S).
    q = x_ref[...].astype(jnp.float32)
    k = k_ref[...]
    v = v_ref[...]
    m = mask_ref[...]

    d = q.shape[-1]
    scale = 1.0 / math.sqrt(d)

    # Fold the scale into Q: S*D multiplies instead of S*S.
    q = q * scale

    # Batched QK^T with contraction over the head dim of BOTH operands —
    # lowers straight to the MXU, no materialized transpose of K.
    qk = jnp.einsum(
        "bqd,bkd->bqk",
        q.astype(mxu_dtype),
        k.astype(mxu_dtype),
        preferred_element_type=jnp.float32,
    )
    qk = qk + m.astype(jnp.float32)  # broadcasts if mask block is (1, S, S)

    # Numerically stable softmax; elementwise math in f32.
    qk_max = jnp.max(qk, axis=-1, keepdims=True)
    p = jnp.exp(qk - qk_max)
    denom = jnp.sum(p, axis=-1, keepdims=True)
    # EUP approximate reciprocal + one Newton-Raphson step (~f32 accurate).
    inv = pl.reciprocal(denom, approx=True)
    inv = inv * (2.0 - denom * inv)
    attn = p * inv

    out = jnp.einsum(
        "bqk,bkd->bqd",
        attn.astype(mxu_dtype),
        v.astype(mxu_dtype),
        preferred_element_type=jnp.float32,
    )
    o_ref[...] = out.astype(o_ref.dtype)


def attention(x1, k1, v2, mask, *, batch_block=1, mask_batch_invariant=False,
              use_bf16_mxu=False):
    B, S, D = x1.shape
    assert k1.shape == (B, S, D) and v2.shape == (B, S, D)
    assert B % batch_block == 0
    Bb = batch_block

    if mask_batch_invariant:
        # Mask is identical for every batch element: DMA a single (1, S, S)
        # tile; the constant block index keeps it resident across grid steps.
        mask_in = mask[:1]
        mask_spec = pl.BlockSpec((1, S, S), lambda b: (0, 0, 0))
    else:
        assert mask.shape == (B, S, S)
        mask_in = mask
        mask_spec = pl.BlockSpec((Bb, S, S), lambda b: (b, 0, 0))

    mxu_dtype = jnp.bfloat16 if use_bf16_mxu else jnp.float32
    kernel = functools.partial(attention_kernel, mxu_dtype=mxu_dtype)

    return pl.pallas_call(
        kernel,
        out_shape=jax.ShapeDtypeStruct((B, S, D), x1.dtype),
        grid_spec=pltpu.PrefetchScalarGridSpec(
            num_scalar_prefetch=0,
            grid=(B // Bb,),
            in_specs=[
                pl.BlockSpec((Bb, S, D), lambda b: (b, 0, 0)),
                pl.BlockSpec((Bb, S, D), lambda b: (b, 0, 0)),
                pl.BlockSpec((Bb, S, D), lambda b: (b, 0, 0)),
                mask_spec,
            ],
            out_specs=pl.BlockSpec((Bb, S, D), lambda b: (b, 0, 0)),
        ),
        compiler_params=pltpu.CompilerParams(
            dimension_semantics=("parallel",),
            vmem_limit_bytes=32 * 1024 * 1024,
        ),
    )(x1, k1, v2, mask_in)


def attention_ref(x1, k1, v2, mask):
    d = x1.shape[-1]
    qk = jnp.einsum("bsd,btd->bst", x1, k1) / math.sqrt(d) + mask
    attn = jax.nn.softmax(qk, axis=-1)
    return jnp.einsum("bst,btd->bsd", attn, v2)


if __name__ == "__main__":
    B, S, D = 2, 128, 32

    key = jax.random.PRNGKey(0)
    kx, kk, kv = jax.random.split(key, 3)
    x1 = jax.random.normal(kx, (B, S, D), dtype=jnp.float32)
    k1 = jax.random.normal(kk, (B, S, D), dtype=jnp.float32)
    v2 = jax.random.normal(kv, (B, S, D), dtype=jnp.float32)

    # Reproduce the original script's mask semantics: (rand > 0.7).fill_(-1e9)
    # fills the ENTIRE tensor -> a batch-invariant constant additive mask.
    mask = jnp.full((B, S, S), -1e9, dtype=jnp.float32)

    ref = attention_ref(x1, k1, v2, mask)

    # Exact f32 path, general per-batch mask BlockSpec.
    out = attention(x1, k1, v2, mask)
    out = jax.block_until_ready(out)
    assert out.shape == (B, S, D)
    assert jnp.allclose(out, ref, atol=1e-4, rtol=1e-4), "f32 path mismatch"

    # Optimized path: resident batch-invariant mask + bf16 MXU operands
    # (v6e/v7x win, harmless on v5e); looser tolerance for bf16 numerics.
    out_fast = attention(
        x1, k1, v2, mask, mask_batch_invariant=True, use_bf16_mxu=True
    )
    out_fast = jax.block_until_ready(out_fast)
    assert jnp.allclose(out_fast, ref, atol=3e-2, rtol=3e-2), "bf16 path mismatch"

    print("KERNEL_OK")
</pallas_src>

<mosaic_0001>
module attributes {stable_mosaic.version = 11 : i64} {
  func.func @attention_kernel(%arg0: i32, %arg1: memref<1x128x32xf32, #tpu.memory_space<vmem>>, %arg2: memref<1x128x32xf32, #tpu.memory_space<vmem>>, %arg3: memref<1x128x32xf32, #tpu.memory_space<vmem>>, %arg4: memref<1x128x128xf32, #tpu.memory_space<vmem>>, %arg5: memref<1x128x32xf32, #tpu.memory_space<vmem>>) attributes {dimension_semantics = [#tpu.dimension_semantics<parallel>], iteration_bounds = array<i64: 2>, scalar_prefetch = 0 : i64, scratch_operands = 0 : i64, tpu.core_type = #tpu.core_type<tc>, window_params = [{transform_indices = @transform_0, window_bounds = array<i64: 1, 128, 32>}, {transform_indices = @transform_1, window_bounds = array<i64: 1, 128, 32>}, {transform_indices = @transform_2, window_bounds = array<i64: 1, 128, 32>}, {transform_indices = @transform_3, window_bounds = array<i64: 1, 128, 128>}, {transform_indices = @transform_4, window_bounds = array<i64: 1, 128, 32>}]} {
    %c0 = arith.constant 0 : index
    %c0_0 = arith.constant 0 : index
    %c0_1 = arith.constant 0 : index
    %0 = vector.load %arg1[%c0, %c0_0, %c0_1] : memref<1x128x32xf32, #tpu.memory_space<vmem>>, vector<1x128x32xf32>
    %c0_2 = arith.constant 0 : index
    %c0_3 = arith.constant 0 : index
    %c0_4 = arith.constant 0 : index
    %1 = vector.load %arg2[%c0_2, %c0_3, %c0_4] : memref<1x128x32xf32, #tpu.memory_space<vmem>>, vector<1x128x32xf32>
    %c0_5 = arith.constant 0 : index
    %c0_6 = arith.constant 0 : index
    %c0_7 = arith.constant 0 : index
    %2 = vector.load %arg3[%c0_5, %c0_6, %c0_7] : memref<1x128x32xf32, #tpu.memory_space<vmem>>, vector<1x128x32xf32>
    %c0_8 = arith.constant 0 : index
    %c0_9 = arith.constant 0 : index
    %c0_10 = arith.constant 0 : index
    %3 = vector.load %arg4[%c0_8, %c0_9, %c0_10] : memref<1x128x128xf32, #tpu.memory_space<vmem>>, vector<1x128x128xf32>
    %cst = arith.constant 0.176776692 : f32
    %4 = vector.broadcast %cst : f32 to vector<1x128x32xf32>
    %5 = arith.mulf %0, %4 : vector<1x128x32xf32>
    "tpu.trace_start"() <{level = 10 : i32, message = "bqd,bkd->bqk"}> : () -> ()
    %cst_11 = arith.constant dense<0.000000e+00> : vector<1x128x128xf32>
    %6 = tpu.matmul %5, %1, %cst_11 {dimension_numbers = #tpu.dot_dimension_numbers<[2], [2], [1], [1], [0, 0, 0, 1, 1, 1], [0], [0]>} : vector<1x128x32xf32>, vector<1x128x32xf32>, vector<1x128x128xf32> -> vector<1x128x128xf32>
    "tpu.trace_stop"() : () -> ()
    %7 = arith.addf %6, %3 : vector<1x128x128xf32>
    %cst_12 = arith.constant dense<0xFF800000> : vector<1x128xf32>
    %8 = vector.multi_reduction <maximumf>, %7, %cst_12 [2] : vector<1x128x128xf32> to vector<1x128xf32>
    %9 = vector.shape_cast %8 : vector<1x128xf32> to vector<1x128x1xf32>
    %10 = vector.broadcast %9 : vector<1x128x1xf32> to vector<1x128x128xf32>
    %11 = arith.subf %7, %10 : vector<1x128x128xf32>
    %12 = math.exp %11 : vector<1x128x128xf32>
    %cst_13 = arith.constant dense<0.000000e+00> : vector<1x128xf32>
    %13 = vector.multi_reduction <add>, %12, %cst_13 [2] : vector<1x128x128xf32> to vector<1x128xf32>
    %14 = vector.shape_cast %13 : vector<1x128xf32> to vector<1x128x1xf32>
    %15 = tpu.reciprocal %14 {approx = true} : vector<1x128x1xf32> -> vector<1x128x1xf32>
    %16 = arith.mulf %14, %15 : vector<1x128x1xf32>
    %cst_14 = arith.constant 2.000000e+00 : f32
    %17 = vector.broadcast %cst_14 : f32 to vector<1x128x1xf32>
    %18 = arith.subf %17, %16 : vector<1x128x1xf32>
    %19 = arith.mulf %15, %18 : vector<1x128x1xf32>
    %20 = vector.broadcast %19 : vector<1x128x1xf32> to vector<1x128x128xf32>
    %21 = arith.mulf %12, %20 : vector<1x128x128xf32>
    "tpu.trace_start"() <{level = 10 : i32, message = "bqk,bkd->bqd"}> : () -> ()
    %cst_15 = arith.constant dense<0.000000e+00> : vector<1x128x32xf32>
    %22 = tpu.matmul %21, %2, %cst_15 {dimension_numbers = #tpu.dot_dimension_numbers<[2], [1], [1], [2], [0, 0, 0, 1, 1, 2], [0], [0]>} : vector<1x128x128xf32>, vector<1x128x32xf32>, vector<1x128x32xf32> -> vector<1x128x32xf32>
    "tpu.trace_stop"() : () -> ()
    %c0_16 = arith.constant 0 : index
    %c0_17 = arith.constant 0 : index
    %c0_18 = arith.constant 0 : index
    %23 = vector.load %arg5[%c0_16, %c0_17, %c0_18] : memref<1x128x32xf32, #tpu.memory_space<vmem>>, vector<1x128x32xf32>
    tpu.vector_store %arg5[%c0_16, %c0_17, %c0_18], %22 {strides = array<i32>} : memref<1x128x32xf32, #tpu.memory_space<vmem>>, vector<1x128x32xf32>,
    return
  }
  func.func @transform_0(%arg0: i32) -> (i32, i32, i32) {
    %c0_i32 = arith.constant 0 : i32
    %c0_i32_0 = arith.constant 0 : i32
    %c0_i32_1 = arith.constant 0 : i32
    return %arg0, %c0_i32, %c0_i32_0 : i32, i32, i32
  }
  func.func @transform_1(%arg0: i32) -> (i32, i32, i32) {
    %c0_i32 = arith.constant 0 : i32
    %c0_i32_0 = arith.constant 0 : i32
    %c0_i32_1 = arith.constant 0 : i32
    return %arg0, %c0_i32, %c0_i32_0 : i32, i32, i32
  }
  func.func @transform_2(%arg0: i32) -> (i32, i32, i32) {
    %c0_i32 = arith.constant 0 : i32
    %c0_i32_0 = arith.constant 0 : i32
    %c0_i32_1 = arith.constant 0 : i32
    return %arg0, %c0_i32, %c0_i32_0 : i32, i32, i32
  }
  func.func @transform_3(%arg0: i32) -> (i32, i32, i32) {
    %c0_i32 = arith.constant 0 : i32
    %c0_i32_0 = arith.constant 0 : i32
    %c0_i32_1 = arith.constant 0 : i32
    return %arg0, %c0_i32, %c0_i32_0 : i32, i32, i32
  }
  func.func @transform_4(%arg0: i32) -> (i32, i32, i32) {
    %c0_i32 = arith.constant 0 : i32
    %c0_i32_0 = arith.constant 0 : i32
    %c0_i32_1 = arith.constant 0 : i32
    return %arg0, %c0_i32, %c0_i32_0 : i32, i32, i32
  }
}

</mosaic_0001>

<bundles_post_ra>
// kernel: tpu_custom_call.1
= control target key start
LH: loop header
LB: loop body
LE: loop exit
PB: predicated region body
PF: predicated region fallthrough
CT: control target
= control target key end

     0   :  { %s1359_s15 = smov 0   ;;  %s1674_s0 = inlined_call_operand.vmem [shape: f32[2,128,32], index: 0, kind: input, shape index: {}]   ;;  %s1675_s1 = inlined_call_operand.vmem [shape: f32[2,128,32], index: 1, kind: input, shape index: {}]   ;;  %s1676_s2 = inlined_call_operand.vmem [shape: f32[2,128,32], index: 2, kind: input, shape index: {}]   ;;  %s1677_s3 = inlined_call_operand.vmem [shape: f32[2,128,128], index: 3, kind: input, shape index: {}]   ;;  %s1678_s4 = inlined_call_operand.vmem [shape: f32[2,128,32], index: 4, kind: output, shape index: {}]  }
   0x1 LB: > { %s1024_s16 = sadd.s32 4294967295, %s1332_s15   ;;  %p1028_p0 = scmp.ge.s32.totalorder %s1332_s15, 1  ;;  %s1332_s15 = sphi %s1359_s15, %s14_s15  }
   0x2   : > { %p192_p1 = scmp.lt.s32.totalorder %s1332_s15, 3 }
   0x4   : > { %p193_p2 = pnand %p1028_p0, %p192_p1 }
   0x5   : > { %p233_p3 = scmp.lt.s32.totalorder (!%p193_p2), %s1024_s16, 1 }
   0x6   : > { %196 = sbr.rel (%p193_p2) target bundleno = 821 (0x335), region = 36 }
   0xb   : > { %s1680_s16 = smov (!%p233_p3, %s1024_s16), 1  ;;  %vm338_vm0 = vcmask 261120  }
   0xc   : > { %s1367_s17 = sshll.u32 %s1680_s16, 7 }
   0xd   : > { %s1373_s20 = scalar_lea.vmem %s1675_s1, %s1367_s17  ;;  %s1383_s23 = scalar_lea.vmem %s1674_s0, %s1367_s17 }
   0xe   : > { %v289_v0 = vld [vmem:[%s1373_s20 + $0x78] sm:$0xff]  ;;  %v288_v1 = vld [vmem:[%s1373_s20 + $0x70] sm:$0xff]  ;;  %v287_v2 = vld [vmem:[%s1373_s20 + $0x68] sm:$0xff]  ;;  %s1465_s26 = scalar_lea.vmem %s1677_s3, %s1367_s17  ;;  %s1535_s29 = scalar_lea.vmem %s1676_s2, %s1367_s17 }
   0xf   : > { %1142 = vmatprep.subr.msk.mxu0 %vm338_vm0, %v289_v0  ;;  %v258_v3 = vld [vmem:[%s1383_s23] sm:$0xff]  ;;  %v285_v6 = vld [vmem:[%s1373_s20 + $0x58] sm:$0xff]  ;;  %v284_v7 = vld [vmem:[%s1373_s20 + $0x50] sm:$0xff]  ;;  %s1637_s6 = scalar_lea.vmem %s1678_s4, %s1367_s17 }
  0x10   : > { %1143 = vmatpush3.xpose.msk.msra.mxu0 %vm338_vm0, %v289_v0  ;;  %v322_v4 = vmul.f32 0.17677669, %v258_v3  ;;  %v286_v5 = vld [vmem:[%s1373_s20 + $0x60] sm:$0xff]  ;;  %v283_v8 = vld [vmem:[%s1373_s20 + $0x48] sm:$0xff]  ;;  %v281_v10 = vld [vmem:[%s1373_s20 + $0x38] sm:$0xff] }
  0x11   : > { %1144 = vmatprep.subr.msk.mxu0 %vm338_vm0, %v288_v1  ;;  %v282_v9 = vld [vmem:[%s1373_s20 + $0x40] sm:$0xff]  ;;  %v280_v11 = vld [vmem:[%s1373_s20 + $0x30] sm:$0xff]  ;;  %v279_v12 = vld [vmem:[%s1373_s20 + $0x28] sm:$0xff] }
  0x12   : > { %1174 = vmatprep.mubr.msk.f32.mxu0 %vm338_vm0, %v322_v4  ;;  %v278_v13 = vld [vmem:[%s1373_s20 + $0x20] sm:$0xff]  ;;  %v277_v14 = vld [vmem:[%s1373_s20 + $0x18] sm:$0xff]  ;;  %v276_v15 = vld [vmem:[%s1373_s20 + $0x10] sm:$0xff] }
  0x13   : > { %v275_v16 = vld [vmem:[%s1373_s20 + $0x8] sm:$0xff]  ;;  %v274_v17 = vld [vmem:[%s1373_s20] sm:$0xff]  ;;  %v260_v19 = vld [vmem:[%s1383_s23 + $0x10] sm:$0xff] }
  0x14   : > { %1145 = vmatpush3.xpose.msk.msra.mxu0 %vm338_vm0, %v288_v1  ;;  %v259_v18 = vld [vmem:[%s1383_s23 + $0x8] sm:$0xff]  ;;  %v324_v21 = vmul.f32 0.17677669, %v260_v19  ;;  %v261_v22 = vld [vmem:[%s1383_s23 + $0x18] sm:$0xff]  ;;  %v262_v23 = vld [vmem:[%s1383_s23 + $0x20] sm:$0xff] }
  0x15   : > { %1146 = vmatprep.subr.msk.mxu0 %vm338_vm0, %v287_v2  ;;  %v323_v20 = vmul.f32 0.17677669, %v259_v18  ;;  %v325_v24 = vmul.f32 0.17677669, %v261_v22  ;;  %v326_v25 = vmul.f32 0.17677669, %v262_v23 }
  0x16   : > { %v263_v26 = vld [vmem:[%s1383_s23 + $0x28] sm:$0xff]  ;;  %v264_v27 = vld [vmem:[%s1383_s23 + $0x30] sm:$0xff]  ;;  %v265_v30 = vld [vmem:[%s1383_s23 + $0x38] sm:$0xff] }
  0x17   : > { %v327_v28 = vmul.f32 0.17677669, %v263_v26  ;;  %v328_v29 = vmul.f32 0.17677669, %v264_v27  ;;  %v266_v31 = vld [vmem:[%s1383_s23 + $0x40] sm:$0xff]  ;;  %v267_v34 = vld [vmem:[%s1383_s23 + $0x48] sm:$0xff] }
  0x18   : > { %1147 = vmatpush3.xpose.msk.msra.mxu0 %vm338_vm0, %v287_v2  ;;  %v329_v32 = vmul.f32 0.17677669, %v265_v30  ;;  %v330_v33 = vmul.f32 0.17677669, %v266_v31  ;;  %v268_v35 = vld [vmem:[%s1383_s23 + $0x50] sm:$0xff]  ;;  %v269_v38 = vld [vmem:[%s1383_s23 + $0x58] sm:$0xff] }
  0x19   : > { %1148 = vmatprep.subr.msk.mxu0 %vm338_vm0, %v286_v5  ;;  %v331_v36 = vmul.f32 0.17677669, %v267_v34  ;;  %v332_v37 = vmul.f32 0.17677669, %v268_v35  ;;  %v270_v39 = vld [vmem:[%s1383_s23 + $0x60] sm:$0xff]  ;;  %v271_v42 = vld [vmem:[%s1383_s23 + $0x68] sm:$0xff] }
  0x1a   : > { %v333_v40 = vmul.f32 0.17677669, %v269_v38  ;;  %v334_v41 = vmul.f32 0.17677669, %v270_v39  ;;  %v272_v43 = vld [vmem:[%s1383_s23 + $0x70] sm:$0xff]  ;;  %v273_v46 = vld [vmem:[%s1383_s23 + $0x78] sm:$0xff] }
  0x1b   : > { %v335_v44 = vmul.f32 0.17677669, %v271_v42  ;;  %v336_v45 = vmul.f32 0.17677669, %v272_v43  ;;  %v337_v47 = vmul.f32 0.17677669, %v273_v46 }
  0x1c   : > { %1149 = vmatpush3.xpose.msk.msra.mxu0 %vm338_vm0, %v286_v5  ;;  %v306_v49 = vld [vmem:[%s1465_s26] sm:$0xff]  ;;  %v307_v52 = vld [vmem:[%s1465_s26 + $0x8] sm:$0xff]  ;;  %v308_v54 = vld [vmem:[%s1465_s26 + $0x10] sm:$0xff] }
  0x1d   : > { %1150 = vmatprep.subr.msk.mxu0 %vm338_vm0, %v285_v6  ;;  %v309_v58 = vld [vmem:[%s1465_s26 + $0x18] sm:$0xff]  ;;  %v310_v60 = vld [vmem:[%s1465_s26 + $0x20] sm:$0xff]  ;;  %v311_v0 = vld [vmem:[%s1465_s26 + $0x28] sm:$0xff] }
  0x1e   : > { %v312_v2 = vld [vmem:[%s1465_s26 + $0x30] sm:$0xff]  ;;  %v317_v18 = vld [vmem:[%s1465_s26 + $0x58] sm:$0xff]  ;;  %v303_v34 = vld [vmem:[%s1535_s29 + $0x68] sm:$0xff] }
  0x1f   : > { %v320_v26 = vld [vmem:[%s1465_s26 + $0x70] sm:$0xff]  ;;  %v321_v30 = vld [vmem:[%s1465_s26 + $0x78] sm:$0xff] }
  0x20   : > { %1151 = vmatpush3.xpose.msk.msra.mxu0 %vm338_vm0, %v285_v6  ;;  %v313_v6 = vld [vmem:[%s1465_s26 + $0x38] sm:$0xff] }
  0x21   : > { %1152 = vmatprep.subr.msk.mxu0 %vm338_vm0, %v284_v7 }
  0x24   : > { %1153 = vmatpush3.xpose.msk.msra.mxu0 %vm338_vm0, %v284_v7 }
  0x25   : > { %1154 = vmatprep.subr.msk.mxu0 %vm338_vm0, %v283_v8 }
  0x28   : > { %1155 = vmatpush3.xpose.msk.msra.mxu0 %vm338_vm0, %v283_v8  ;;  %v314_v8 = vld [vmem:[%s1465_s26 + $0x40] sm:$0xff] }
  0x29   : > { %1156 = vmatprep.subr.msk.mxu0 %vm338_vm0, %v282_v9 }
  0x2c   : > { %1157 = vmatpush3.xpose.msk.msra.mxu0 %vm338_vm0, %v282_v9 }
  0x2d   : > { %1158 = vmatprep.subr.msk.mxu0 %vm338_vm0, %v281_v10 }
  0x30   : > { %1159 = vmatpush3.xpose.msk.msra.mxu0 %vm338_vm0, %v281_v10 }
  0x31   : > { %1160 = vmatprep.subr.msk.mxu0 %vm338_vm0, %v280_v11 }
  0x34   : > { %1161 = vmatpush3.xpose.msk.msra.mxu0 %vm338_vm0, %v280_v11 }
  0x35   : > { %1162 = vmatprep.subr.msk.mxu0 %vm338_vm0, %v279_v12 }
  0x38   : > { %1163 = vmatpush3.xpose.msk.msra.mxu0 %vm338_vm0, %v279_v12  ;;  %v315_v12 = vld [vmem:[%s1465_s26 + $0x48] sm:$0xff] }
  0x39   : > { %1164 = vmatprep.subr.msk.mxu0 %vm338_vm0, %v278_v13 }
  0x3c   : > { %1165 = vmatpush3.xpose.msk.msra.mxu0 %vm338_vm0, %v278_v13 }
  0x3d   : > { %1166 = vmatprep.subr.msk.mxu0 %vm338_vm0, %v277_v14 }
  0x40   : > { %1167 = vmatpush3.xpose.msk.msra.mxu0 %vm338_vm0, %v277_v14  ;;  %v316_v14 = vld [vmem:[%s1465_s26 + $0x50] sm:$0xff] }
  0x41   : > { %1168 = vmatprep.subr.msk.mxu0 %vm338_vm0, %v276_v15 }
  0x44   : > { %1169 = vmatpush3.xpose.msk.msra.mxu0 %vm338_vm0, %v276_v15 }
  0x45   : > { %1170 = vmatprep.subr.msk.mxu0 %vm338_vm0, %v275_v16 }
  0x48   : > { %1171 = vmatpush3.xpose.msk.msra.mxu0 %vm338_vm0, %v275_v16 }
  0x49   : > { %1172 = vmatprep.subr.msk.mxu0 %vm338_vm0, %v274_v17 }
  0x4c   : > { %1173 = vmatpush3.xpose.msk.msra.mxu0 %vm338_vm0, %v274_v17 }
  0x4f   : > { %1175 = vmatmul.mubr.msk.f32.vlgmr.msra.gmra.mxu0 %vm338_vm0, %v323_v20  ;;  %v318_v20 = vld [vmem:[%s1465_s26 + $0x60] sm:$0xff] }
  0x50   : > { %1177 = vmatprep.mubr.msk.f32.mxu0 %vm338_vm0, %v324_v21 }
  0x53   : > { %1178 = vmatmul.mubr.msk.f32.gmra.mxu0 %vm338_vm0, %v325_v24  ;;  %v319_v24 = vld [vmem:[%s1465_s26 + $0x68] sm:$0xff] }
  0x54   : > { %1180 = vmatprep.mubr.msk.f32.mxu0 %vm338_vm0, %v326_v25 }
  0x57   : > { %1181 = vmatmul.mubr.msk.f32.gmra.mxu0 %vm338_vm0, %v327_v28 }
  0x58   : > { %1183 = vmatprep.mubr.msk.f32.mxu0 %vm338_vm0, %v328_v29 }
  0x5b   : > { %1184 = vmatmul.mubr.msk.f32.gmra.mxu0 %vm338_vm0, %v329_v32  ;;  %v305_v32 = vld [vmem:[%s1535_s29 + $0x78] sm:$0xff] }
  0x5c   : > { %1186 = vmatprep.mubr.msk.f32.mxu0 %vm338_vm0, %v330_v33  ;;  %v304_v33 = vld [vmem:[%s1535_s29 + $0x70] sm:$0xff]  ;;  %1198 = vmatprep.subr.mxu1 %v305_v32 }
  0x5d   : > { %1199 = vmatpush3.msra.mxu1 %v305_v32  ;;  %v299_v32 = vld [vmem:[%s1535_s29 + $0x48] sm:$0xff] }
  0x5e   : > { %1200 = vmatprep.subr.mxu1 %v304_v33 }
  0x5f   : > { %1187 = vmatmul.mubr.msk.f32.gmra.mxu0 %vm338_vm0, %v331_v36  ;;  %1201 = vmatpush3.msra.mxu1 %v304_v33  ;;  %v298_v33 = vld [vmem:[%s1535_s29 + $0x40] sm:$0xff] }
  0x60   : > { %1189 = vmatprep.mubr.msk.f32.mxu0 %vm338_vm0, %v332_v37  ;;  %1202 = vmatprep.subr.mxu1 %v303_v34 }
  0x61   : > { %1203 = vmatpush3.msra.mxu1 %v303_v34 }
  0x63   : > { %1190 = vmatmul.mubr.msk.f32.gmra.mxu0 %vm338_vm0, %v333_v40 }
  0x64   : > { %1192 = vmatprep.mubr.msk.f32.mxu0 %vm338_vm0, %v334_v41 }
  0x67   : > { %1193 = vmatmul.mubr.msk.f32.gmra.mxu0 %vm338_vm0, %v335_v44 }
  0x68   : > { %1195 = vmatprep.mubr.msk.f32.mxu0 %vm338_vm0, %v336_v45 }
  0x6b   : > { %1196 = vmatmul.mubr.msk.f32.gmra.mxu0 %vm338_vm0, %v337_v47 }
 0x10f   : > { %v1176_v48 = vpop.f32.mrf.mxu0 }
 0x110   : > { %v1473_v56 = vadd.f32 %v1176_v48, %v307_v52 }
 0x111   : > { %v501_v50 = vpop.f32.mrf.mxu0 }
 0x112   : > { %v1468_v51 = vadd.f32 %v501_v50, %v306_v49 }
 0x113   : > { %v1179_v53 = vpop.f32.mrf.mxu0 }
 0x114   : > { %580 = vmax.xlane.f32.xlu0 %v1468_v51  ;;  %v1481_v62 = vadd.f32 %v1179_v53, %v309_v58 }
 0x115   : > { %v511_v55 = vpop.f32.mrf.mxu0 }
 0x116   : > { %v1475_v57 = vadd.f32 %v511_v55, %v308_v54 }
 0x117   : > { %v1182_v59 = vpop.f32.mrf.mxu0 }
 0x118   : > { %584 = vmax.xlane.f32.xlu1 %v1475_v57  ;;  %582 = vmax.xlane.f32.xlu0 %v1473_v56  ;;  %v1489_v4 = vadd.f32 %v1182_v59, %v311_v0 }
 0x119   : > { %v521_v61 = vpop.f32.mrf.mxu0 }
 0x11a   : > { %v1483_v63 = vadd.f32 %v521_v61, %v310_v60 }
 0x11b   : > { %v1185_v1 = vpop.f32.mrf.mxu0 }
 0x11c   : > { %586 = vmax.xlane.f32.xlu1 %v1481_v62  ;;  %588 = vmax.xlane.f32.xlu0 %v1483_v63  ;;  %v1497_v10 = vadd.f32 %v1185_v1, %v313_v6 }
 0x11d   : > { %v531_v3 = vpop.f32.mrf.mxu0 }
 0x11e   : > { %v1491_v5 = vadd.f32 %v531_v3, %v312_v2 }
 0x11f   : > { %v1188_v7 = vpop.f32.mrf.mxu0 }
 0x120   : > { %590 = vmax.xlane.f32.xlu1 %v1489_v4  ;;  %592 = vmax.xlane.f32.xlu0 %v1491_v5  ;;  %v1505_v16 = vadd.f32 %v1188_v7, %v315_v12 }
 0x121   : > { %v541_v9 = vpop.f32.mrf.mxu0 }
 0x122   : > { %v1499_v11 = vadd.f32 %v541_v9, %v314_v8 }
 0x123   : > { %v1191_v13 = vpop.f32.mrf.mxu0 }
 0x124   : > { %594 = vmax.xlane.f32.xlu1 %v1497_v10  ;;  %596 = vmax.xlane.f32.xlu0 %v1499_v11  ;;  %v1513_v22 = vadd.f32 %v1191_v13, %v317_v18 }
 0x125   : > { %v551_v15 = vpop.f32.mrf.mxu0 }
 0x126   : > { %v1507_v17 = vadd.f32 %v551_v15, %v316_v14 }
 0x127   : > { %v1194_v19 = vpop.f32.mrf.mxu0 }
 0x128   : > { %598 = vmax.xlane.f32.xlu1 %v1505_v16  ;;  %600 = vmax.xlane.f32.xlu0 %v1507_v17  ;;  %v1521_v28 = vadd.f32 %v1194_v19, %v319_v24  ;;  %v302_v19 = vld [vmem:[%s1535_s29 + $0x60] sm:$0xff]  ;;  %v301_v24 = vld [vmem:[%s1535_s29 + $0x58] sm:$0xff] }
 0x129   : > { %v561_v21 = vpop.f32.mrf.mxu0  ;;  %1204 = vmatprep.subr.mxu1 %v302_v19 }
 0x12a   : > { %v1515_v23 = vadd.f32 %v561_v21, %v318_v20  ;;  %1205 = vmatpush3.msra.mxu1 %v302_v19 }
 0x12b   : > { %v1197_v25 = vpop.f32.mrf.mxu0  ;;  %1206 = vmatprep.subr.mxu1 %v301_v24 }
 0x12c   : > { %602 = vmax.xlane.f32.xlu1 %v1513_v22  ;;  %604 = vmax.xlane.f32.xlu0 %v1515_v23  ;;  %v1528_v31 = vadd.f32 %v1197_v25, %v321_v30 }
 0x12d   : > { %v571_v27 = vpop.f32.mrf.mxu0  ;;  %1207 = vmatpush3.msra.mxu1 %v301_v24 }
 0x12e   : > { %v1523_v29 = vadd.f32 %v571_v27, %v320_v26  ;;  %v300_v27 = vld [vmem:[%s1535_s29 + $0x50] sm:$0xff] }
 0x12f   : > { %1208 = vmatprep.subr.mxu1 %v300_v27 }
 0x130   : > { %606 = vmax.xlane.f32.xlu1 %v1521_v28  ;;  %608 = vmax.xlane.f32.xlu0 %v1523_v29 }
 0x131   : > { %1209 = vmatpush3.msra.mxu1 %v300_v27 }
 0x132   : > { %1210 = vmatprep.subr.mxu1 %v299_v32 }
 0x133   : > { %1211 = vmatpush3.msra.mxu1 %v299_v32 }
 0x134   : > { %610 = vmax.xlane.f32.xlu1 %v1528_v31  ;;  %1212 = vmatprep.subr.mxu1 %v298_v33 }
 0x135   : > { %1213 = vmatpush3.msra.mxu1 %v298_v33 }
 0x19d   : > { %v581_v35 = vpop.xlane.xlu0 %580 }
 0x19e   : > { %v612_v36 = vsub.f32 %v1468_v51, %v581_v35  ;;  %v297_v35 = vld [vmem:[%s1535_s29 + $0x38] sm:$0xff] }
 0x19f   : > { %1214 = vmatprep.subr.mxu1 %v297_v35 }
 0x1a0   : > { %v628_v37 = vmul.f32 1.442695, %v612_v36  ;;  %1215 = vmatpush3.msra.mxu1 %v297_v35 }
 0x1a1   : > { %v585_v38 = vpop.xlane.xlu1 %584  ;;  %v583_v39 = vpop.xlane.xlu0 %582 }
 0x1a2   : > { %1262 = vpow2.f32 %v628_v37  ;;  %v614_v40 = vsub.f32 %v1475_v57, %v585_v38  ;;  %v613_v41 = vsub.f32 %v1473_v56, %v583_v39  ;;  %v296_v38 = vld [vmem:[%s1535_s29 + $0x30] sm:$0xff] }
 0x1a3   : > { %1216 = vmatprep.subr.mxu1 %v296_v38 }
 0x1a4   : > { %v632_v42 = vmul.f32 1.442695, %v614_v40  ;;  %v630_v43 = vmul.f32 1.442695, %v613_v41  ;;  %v295_v40 = vld [vmem:[%s1535_s29 + $0x28] sm:$0xff]  ;;  %1217 = vmatpush3.msra.mxu1 %v296_v38 }
 0x1a5   : > { %v587_v44 = vpop.xlane.xlu1 %586  ;;  %v589_v45 = vpop.xlane.xlu0 %588  ;;  %1218 = vmatprep.subr.mxu1 %v295_v40 }
 0x1a6   : > { %1264 = vpow2.f32 %v632_v42  ;;  %v615_v46 = vsub.f32 %v1481_v62, %v587_v44  ;;  %v616_v47 = vsub.f32 %v1483_v63, %v589_v45  ;;  %v294_v42 = vld [vmem:[%s1535_s29 + $0x20] sm:$0xff]  ;;  %1219 = vmatpush3.msra.mxu1 %v295_v40  ;;  %v293_v44 = vld [vmem:[%s1535_s29 + $0x18] sm:$0xff]  ;;  %v292_v45 = vld [vmem:[%s1535_s29 + $0x10] sm:$0xff] }
 0x1a7   : > { %1266 = vpow2.f32 %v630_v43  ;;  %1220 = vmatprep.subr.mxu1 %v294_v42 }
 0x1a8   : > { %v634_v48 = vmul.f32 1.442695, %v615_v46  ;;  %v636_v49 = vmul.f32 1.442695, %v616_v47  ;;  %1221 = vmatpush3.msra.mxu1 %v294_v42  ;;  %v291_v46 = vld [vmem:[%s1535_s29 + $0x8] sm:$0xff]  ;;  %v290_v47 = vld [vmem:[%s1535_s29] sm:$0xff] }
 0x1a9   : > { %v591_v50 = vpop.xlane.xlu1 %590  ;;  %v593_v51 = vpop.xlane.xlu0 %592  ;;  %1222 = vmatprep.subr.mxu1 %v293_v44 }
 0x1aa   : > { %1268 = vpow2.f32 %v634_v48  ;;  %v617_v52 = vsub.f32 %v1489_v4, %v591_v50  ;;  %v618_v53 = vsub.f32 %v1491_v5, %v593_v51  ;;  %1223 = vmatpush3.msra.mxu1 %v293_v44 }
 0x1ab   : > { %1270 = vpow2.f32 %v636_v49  ;;  %1224 = vmatprep.subr.mxu1 %v292_v45 }
 0x1ac   : > { %v638_v54 = vmul.f32 1.442695, %v617_v52  ;;  %v640_v55 = vmul.f32 1.442695, %v618_v53  ;;  %1225 = vmatpush3.msra.mxu1 %v292_v45 }
 0x1ad   : > { %v595_v56 = vpop.xlane.xlu1 %594  ;;  %v597_v57 = vpop.xlane.xlu0 %596  ;;  %1226 = vmatprep.subr.mxu1 %v291_v46 }
 0x1ae   : > { %1272 = vpow2.f32 %v638_v54  ;;  %v619_v58 = vsub.f32 %v1497_v10, %v595_v56  ;;  %v620_v59 = vsub.f32 %v1499_v11, %v597_v57  ;;  %1227 = vmatpush3.msra.mxu1 %v291_v46 }
 0x1af   : > { %v1549_v60 = vpop.eup %1262  ;;  %1274 = vpow2.f32 %v640_v55  ;;  %1228 = vmatprep.subr.mxu1 %v290_v47 }
 0x1b0   : > { %v642_v61 = vmul.f32 1.442695, %v619_v58  ;;  %v644_v62 = vmul.f32 1.442695, %v620_v59  ;;  %660 = vadd.xlane.f32.xlu0 %v1549_v60  ;;  %1229 = vmatpush3.msra.mxu1 %v290_v47 }
 0x1b1   : > { %v599_v63 = vpop.xlane.xlu1 %598  ;;  %v601_v0 = vpop.xlane.xlu0 %600 }
 0x1b2   : > { %1276 = vpow2.f32 %v642_v61  ;;  %v621_v1 = vsub.f32 %v1505_v16, %v599_v63  ;;  %v622_v2 = vsub.f32 %v1507_v17, %v601_v0 }
 0x1b3   : > { %v1554_v3 = vpop.eup %1264  ;;  %1278 = vpow2.f32 %v644_v62 }
 0x1b4   : > { %v1556_v4 = vpop.eup %1266  ;;  %v646_v5 = vmul.f32 1.442695, %v621_v1  ;;  %v648_v6 = vmul.f32 1.442695, %v622_v2  ;;  %664 = vadd.xlane.f32.xlu0 %v1554_v3 }
 0x1b5   : > { %662 = vadd.xlane.f32.xlu1 %v1556_v4  ;;  %v603_v7 = vpop.xlane.xlu1 %602  ;;  %v605_v8 = vpop.xlane.xlu0 %604 }
 0x1b6   : > { %1280 = vpow2.f32 %v646_v5  ;;  %v623_v9 = vsub.f32 %v1513_v22, %v603_v7  ;;  %v624_v10 = vsub.f32 %v1515_v23, %v605_v8 }
 0x1b7   : > { %v1562_v11 = vpop.eup %1268  ;;  %1282 = vpow2.f32 %v648_v6 }
 0x1b8   : > { %v1564_v12 = vpop.eup %1270  ;;  %v650_v13 = vmul.f32 1.442695, %v623_v9  ;;  %v652_v14 = vmul.f32 1.442695, %v624_v10 }
 0x1b9   : > { %666 = vadd.xlane.f32.xlu1 %v1562_v11  ;;  %668 = vadd.xlane.f32.xlu0 %v1564_v12  ;;  %v607_v15 = vpop.xlane.xlu1 %606  ;;  %v609_v16 = vpop.xlane.xlu0 %608 }
 0x1ba   : > { %1284 = vpow2.f32 %v650_v13  ;;  %v625_v17 = vsub.f32 %v1521_v28, %v607_v15  ;;  %v626_v18 = vsub.f32 %v1523_v29, %v609_v16 }
 0x1bb   : > { %v1571_v20 = vpop.eup %1272  ;;  %1286 = vpow2.f32 %v652_v14 }
 0x1bc   : > { %v1573_v21 = vpop.eup %1274  ;;  %v654_v22 = vmul.f32 1.442695, %v625_v17  ;;  %v656_v23 = vmul.f32 1.442695, %v626_v18 }
 0x1bd   : > { %670 = vadd.xlane.f32.xlu1 %v1571_v20  ;;  %672 = vadd.xlane.f32.xlu0 %v1573_v21  ;;  %v611_v25 = vpop.xlane.xlu1 %610 }
 0x1be   : > { %1288 = vpow2.f32 %v654_v22  ;;  %v627_v26 = vsub.f32 %v1528_v31, %v611_v25 }
 0x1bf   : > { %v1580_v28 = vpop.eup %1276  ;;  %1290 = vpow2.f32 %v656_v23 }
 0x1c0   : > { %v1582_v29 = vpop.eup %1278  ;;  %v658_v30 = vmul.f32 1.442695, %v627_v26 }
 0x1c1   : > { %674 = vadd.xlane.f32.xlu1 %v1580_v28  ;;  %676 = vadd.xlane.f32.xlu0 %v1582_v29 }
 0x1c2   : > { %1292 = vpow2.f32 %v658_v30 }
 0x1c3   : > { %v1587_v31 = vpop.eup %1280 }
 0x1c4   : > { %v1590_v34 = vpop.eup %1282 }
 0x1c5   : > { %678 = vadd.xlane.f32.xlu1 %v1587_v31  ;;  %680 = vadd.xlane.f32.xlu0 %v1590_v34 }
 0x1c7   : > { %v1595_v36 = vpop.eup %1284 }
 0x1c8   : > { %v1597_v37 = vpop.eup %1286 }
 0x1c9   : > { %682 = vadd.xlane.f32.xlu1 %v1595_v36  ;;  %684 = vadd.xlane.f32.xlu0 %v1597_v37 }
 0x1cb   : > { %v1602_v39 = vpop.eup %1288 }
 0x1cc   : > { %v1605_v41 = vpop.eup %1290 }
 0x1cd   : > { %686 = vadd.xlane.f32.xlu1 %v1602_v39  ;;  %688 = vadd.xlane.f32.xlu0 %v1605_v41 }
 0x1cf   : > { %v1610_v43 = vpop.eup %1292 }
 0x1d1   : > { %690 = vadd.xlane.f32.xlu1 %v1610_v43 }
 0x239   : > { %v661_v48 = vpop.xlane.xlu0 %660 }
 0x23a   : > { %1294 = vrcp.f32 %v661_v48 }
 0x23d   : > { %v665_v49 = vpop.xlane.xlu0 %664 }
 0x23e   : > { %v663_v50 = vpop.xlane.xlu1 %662  ;;  %1296 = vrcp.f32 %v665_v49 }
 0x23f   : > { %1298 = vrcp.f32 %v663_v50 }
 0x242   : > { %v667_v51 = vpop.xlane.xlu1 %666  ;;  %v669_v52 = vpop.xlane.xlu0 %668 }
 0x243   : > { %1300 = vrcp.f32 %v667_v51 }
 0x244   : > { %1302 = vrcp.f32 %v669_v52 }
 0x246   : > { %v671_v53 = vpop.xlane.xlu1 %670  ;;  %v673_v54 = vpop.xlane.xlu0 %672 }
 0x247   : > { %v1295_v55 = vpop.eup %1294  ;;  %1304 = vrcp.f32 %v671_v53 }
 0x248   : > { %v708_v56 = vmul.f32 %v1295_v55, %v661_v48  ;;  %1306 = vrcp.f32 %v673_v54 }
 0x24a   : > { %v724_v57 = vsub.f32 2.0, %v708_v56  ;;  %v675_v58 = vpop.xlane.xlu1 %674  ;;  %v677_v59 = vpop.xlane.xlu0 %676 }
 0x24b   : > { %v1297_v61 = vpop.eup %1296  ;;  %1308 = vrcp.f32 %v675_v58 }
 0x24c   : > { %v1299_v62 = vpop.eup %1298  ;;  %v710_v63 = vmul.f32 %v1297_v61, %v665_v49  ;;  %1310 = vrcp.f32 %v677_v59  ;;  %v740_v0 = vmul.f32 %v1295_v55, %v724_v57 }
 0x24d   : > { %v709_v1 = vmul.f32 %v1299_v62, %v663_v50 }
 0x24e   : > { %v726_v2 = vsub.f32 2.0, %v710_v63  ;;  %v679_v5 = vpop.xlane.xlu1 %678  ;;  %v681_v6 = vpop.xlane.xlu0 %680  ;;  %v756_v7 = vmul.f32 %v1549_v60, %v740_v0 }
 0x24f   : > { %v725_v8 = vsub.f32 2.0, %v709_v1  ;;  %1312 = vrcp.f32 %v679_v5 }
 0x250   : > { %v1301_v9 = vpop.eup %1300  ;;  %v742_v10 = vmul.f32 %v1297_v61, %v726_v2  ;;  %1314 = vrcp.f32 %v681_v6  ;;  %1230 = vmatprep.mubr.f32.mxu1 %v756_v7 }
 0x251   : > { %v1303_v13 = vpop.eup %1302  ;;  %v741_v14 = vmul.f32 %v1299_v62, %v725_v8  ;;  %v711_v15 = vmul.f32 %v1301_v9, %v667_v51 }
 0x252   : > { %v712_v16 = vmul.f32 %v1303_v13, %v669_v52  ;;  %v683_v17 = vpop.xlane.xlu1 %682  ;;  %v685_v18 = vpop.xlane.xlu0 %684  ;;  %v758_v19 = vmul.f32 %v1554_v3, %v742_v10 }
 0x253   : > { %v727_v22 = vsub.f32 2.0, %v711_v15  ;;  %1316 = vrcp.f32 %v683_v17  ;;  %v757_v23 = vmul.f32 %v1556_v4, %v741_v14 }
 0x254   : > { %v1305_v24 = vpop.eup %1304  ;;  %v728_v60 = vsub.f32 2.0, %v712_v16  ;;  %1318 = vrcp.f32 %v685_v18 }
 0x255   : > { %v1307_v25 = vpop.eup %1306  ;;  %v743_v26 = vmul.f32 %v1301_v9, %v727_v22  ;;  %v713_v27 = vmul.f32 %v1305_v24, %v671_v53  ;;  %1231 = vmatmul.mubr.f32.vlgmr.msra.gmra.mxu1 %v757_v23 }
 0x256   : > { %v744_v30 = vmul.f32 %v1303_v13, %v728_v60  ;;  %v714_v32 = vmul.f32 %v1307_v25, %v673_v54  ;;  %v687_v33 = vpop.xlane.xlu1 %686  ;;  %1233 = vmatprep.mubr.f32.mxu1 %v758_v19  ;;  %v689_v35 = vpop.xlane.xlu0 %688 }
 0x257   : > { %v729_v38 = vsub.f32 2.0, %v713_v27  ;;  %1320 = vrcp.f32 %v687_v33  ;;  %v759_v3 = vmul.f32 %v1562_v11, %v743_v26 }
 0x258   : > { %v1309_v40 = vpop.eup %1308  ;;  %v730_v42 = vsub.f32 2.0, %v714_v32  ;;  %1322 = vrcp.f32 %v689_v35  ;;  %v760_v4 = vmul.f32 %v1564_v12, %v744_v30 }
 0x259   : > { %v1311_v44 = vpop.eup %1310  ;;  %v745_v45 = vmul.f32 %v1305_v24, %v729_v38  ;;  %v715_v46 = vmul.f32 %v1309_v40, %v675_v58  ;;  %1234 = vmatmul.mubr.f32.gmra.mxu1 %v759_v3 }
 0x25a   : > { %v746_v47 = vmul.f32 %v1307_v25, %v730_v42  ;;  %v716_v48 = vmul.f32 %v1311_v44, %v677_v59  ;;  %v691_v49 = vpop.xlane.xlu1 %690  ;;  %1236 = vmatprep.mubr.f32.mxu1 %v760_v4 }
 0x25b   : > { %v731_v50 = vsub.f32 2.0, %v715_v46  ;;  %1324 = vrcp.f32 %v691_v49  ;;  %v761_v51 = vmul.f32 %v1571_v20, %v745_v45 }
 0x25c   : > { %v1313_v52 = vpop.eup %1312  ;;  %v732_v53 = vsub.f32 2.0, %v716_v48  ;;  %v762_v11 = vmul.f32 %v1573_v21, %v746_v47 }
 0x25d   : > { %v1315_v54 = vpop.eup %1314  ;;  %v747_v55 = vmul.f32 %v1309_v40, %v731_v50  ;;  %v717_v56 = vmul.f32 %v1313_v52, %v679_v5  ;;  %1237 = vmatmul.mubr.f32.gmra.mxu1 %v761_v51 }
 0x25e   : > { %v748_v12 = vmul.f32 %v1311_v44, %v732_v53  ;;  %v718_v57 = vmul.f32 %v1315_v54, %v681_v6  ;;  %1239 = vmatprep.mubr.f32.mxu1 %v762_v11 }
 0x25f   : > { %v733_v58 = vsub.f32 2.0, %v717_v56  ;;  %v763_v59 = vmul.f32 %v1580_v28, %v747_v55 }
 0x260   : > { %v1317_v61 = vpop.eup %1316  ;;  %v734_v62 = vsub.f32 2.0, %v718_v57  ;;  %v764_v63 = vmul.f32 %v1582_v29, %v748_v12 }
 0x261   : > { %v1319_v0 = vpop.eup %1318  ;;  %v749_v20 = vmul.f32 %v1313_v52, %v733_v58  ;;  %v719_v1 = vmul.f32 %v1317_v61, %v683_v17  ;;  %1240 = vmatmul.mubr.f32.gmra.mxu1 %v763_v59 }
 0x262   : > { %v750_v2 = vmul.f32 %v1315_v54, %v734_v62  ;;  %v720_v21 = vmul.f32 %v1319_v0, %v685_v18  ;;  %1242 = vmatprep.mubr.f32.mxu1 %v764_v63 }
 0x263   : > { %v735_v7 = vsub.f32 2.0, %v719_v1  ;;  %v765_v5 = vmul.f32 %v1587_v31, %v749_v20 }
 0x264   : > { %v1321_v8 = vpop.eup %1320  ;;  %v736_v6 = vsub.f32 2.0, %v720_v21  ;;  %v766_v9 = vmul.f32 %v1590_v34, %v750_v2 }
 0x265   : > { %v1323_v10 = vpop.eup %1322  ;;  %v751_v28 = vmul.f32 %v1317_v61, %v735_v7  ;;  %v721_v13 = vmul.f32 %v1321_v8, %v687_v33  ;;  %1243 = vmatmul.mubr.f32.gmra.mxu1 %v765_v5 }
 0x266   : > { %v752_v14 = vmul.f32 %v1319_v0, %v736_v6  ;;  %v722_v29 = vmul.f32 %v1323_v10, %v689_v35  ;;  %1245 = vmatprep.mubr.f32.mxu1 %v766_v9 }
 0x267   : > { %v737_v15 = vsub.f32 2.0, %v721_v13  ;;  %v767_v16 = vmul.f32 %v1595_v36, %v751_v28 }
 0x268   : > { %v1325_v17 = vpop.eup %1324  ;;  %v738_v18 = vsub.f32 2.0, %v722_v29  ;;  %v768_v19 = vmul.f32 %v1597_v37, %v752_v14 }
 0x269   : > { %v753_v31 = vmul.f32 %v1321_v8, %v737_v15  ;;  %v723_v22 = vmul.f32 %v1325_v17, %v691_v49  ;;  %1246 = vmatmul.mubr.f32.gmra.mxu1 %v767_v16 }
 0x26a   : > { %v754_v23 = vmul.f32 %v1323_v10, %v738_v18  ;;  %1248 = vmatprep.mubr.f32.mxu1 %v768_v19 }
 0x26b   : > { %v739_v34 = vsub.f32 2.0, %v723_v22  ;;  %v769_v24 = vmul.f32 %v1602_v39, %v753_v31 }
 0x26c   : > { %v770_v60 = vmul.f32 %v1605_v41, %v754_v23 }
 0x26d   : > { %v755_v25 = vmul.f32 %v1325_v17, %v739_v34  ;;  %1249 = vmatmul.mubr.f32.gmra.mxu1 %v769_v24 }
 0x26e   : > { %1251 = vmatprep.mubr.f32.mxu1 %v770_v60 }
 0x26f   : > { %v771_v36 = vmul.f32 %v1610_v43, %v755_v25 }
 0x271   : > { %1252 = vmatmul.mubr.f32.gmra.mxu1 %v771_v36 }
 0x315   : > { %v1232_v37 = vpop.f32.mrf.mxu1 }
 0x316   : > { %918 = vst.msk [vmem:[%s1637_s6 + $0x8] sm:$0xff] %vm338_vm0, %v1232_v37 }
 0x317   : > { %v838_v39 = vpop.f32.mrf.mxu1 }
 0x318   : > { %917 = vst.msk [vmem:[%s1637_s6] sm:$0xff] %vm338_vm0, %v838_v39 }
 0x319   : > { %v1235_v41 = vpop.f32.mrf.mxu1 }
 0x31a   : > { %920 = vst.msk [vmem:[%s1637_s6 + $0x18] sm:$0xff] %vm338_vm0, %v1235_v41 }
 0x31b   : > { %v848_v43 = vpop.f32.mrf.mxu1 }
 0x31c   : > { %919 = vst.msk [vmem:[%s1637_s6 + $0x10] sm:$0xff] %vm338_vm0, %v848_v43 }
 0x31d   : > { %v1238_v26 = vpop.f32.mrf.mxu1 }
 0x31e   : > { %922 = vst.msk [vmem:[%s1637_s6 + $0x28] sm:$0xff] %vm338_vm0, %v1238_v26 }
 0x31f   : > { %v858_v27 = vpop.f32.mrf.mxu1 }
 0x320   : > { %921 = vst.msk [vmem:[%s1637_s6 + $0x20] sm:$0xff] %vm338_vm0, %v858_v27 }
 0x321   : > { %v1241_v30 = vpop.f32.mrf.mxu1 }
 0x322   : > { %924 = vst.msk [vmem:[%s1637_s6 + $0x38] sm:$0xff] %vm338_vm0, %v1241_v30 }
 0x323   : > { %v868_v32 = vpop.f32.mrf.mxu1 }
 0x324   : > { %923 = vst.msk [vmem:[%s1637_s6 + $0x30] sm:$0xff] %vm338_vm0, %v868_v32 }
 0x325   : > { %v1244_v33 = vpop.f32.mrf.mxu1 }
 0x326   : > { %926 = vst.msk [vmem:[%s1637_s6 + $0x48] sm:$0xff] %vm338_vm0, %v1244_v33 }
 0x327   : > { %v878_v35 = vpop.f32.mrf.mxu1 }
 0x328   : > { %925 = vst.msk [vmem:[%s1637_s6 + $0x40] sm:$0xff] %vm338_vm0, %v878_v35 }
 0x329   : > { %v1247_v38 = vpop.f32.mrf.mxu1 }
 0x32a   : > { %928 = vst.msk [vmem:[%s1637_s6 + $0x58] sm:$0xff] %vm338_vm0, %v1247_v38 }
 0x32b   : > { %v888_v3 = vpop.f32.mrf.mxu1 }
 0x32c   : > { %927 = vst.msk [vmem:[%s1637_s6 + $0x50] sm:$0xff] %vm338_vm0, %v888_v3 }
 0x32d   : > { %v1250_v40 = vpop.f32.mrf.mxu1 }
 0x32e   : > { %930 = vst.msk [vmem:[%s1637_s6 + $0x68] sm:$0xff] %vm338_vm0, %v1250_v40 }
 0x32f   : > { %v898_v42 = vpop.f32.mrf.mxu1 }
 0x330   : > { %929 = vst.msk [vmem:[%s1637_s6 + $0x60] sm:$0xff] %vm338_vm0, %v898_v42 }
 0x331   : > { %v1253_v4 = vpop.f32.mrf.mxu1 }
 0x332   : > { %932 = vst.msk [vmem:[%s1637_s6 + $0x78] sm:$0xff] %vm338_vm0, %v1253_v4 }
 0x333   : > { %v908_v44 = vpop.f32.mrf.mxu1 }
 0x334   : > { %931 = vst.msk [vmem:[%s1637_s6 + $0x70] sm:$0xff] %vm338_vm0, %v908_v44 }
 0x335 PF: > { %s14_s15 = sadd.s32 1, %s1332_s15  }
 0x336   : > { %p11_p4 = scmp.ge.s32.totalorder %s14_s15, 4  }
 0x338   :  { %13 = sbr.rel (!%p11_p4) target bundleno = 1 (0x1), region = 75 }

</bundles_post_ra>
